<compile_context>
chip_gen: v5e
topology: v5e:2x2
jax: 0.10.0
libtpu: 0.0.40
codegen_flags: <defaults>
</compile_context>

<pallas_src>
import functools

import jax
import jax.numpy as jnp
from jax.experimental import pallas as pl
from jax.experimental.pallas import tpu as pltpu


# ----------------------------------------------------------------------------
# helpers
# ----------------------------------------------------------------------------
def _round_up(x, m):
    return (x + m - 1) // m * m


def _largest_div_tile(dim, cap, step):
    """Largest multiple-of-`step` divisor of dim that is <= cap; else full dim."""
    if dim % step != 0:
        return dim
    best = step
    t = step
    while t <= min(dim, cap):
        if dim % t == 0:
            best = t
        t += step
    return best


def _hw_tiling(hw):
    """Always-tiled H*W rows: tile <= 512, pad hw up to a tile multiple."""
    if hw <= 512:
        return hw, hw
    t = 512
    return t, _round_up(hw, t)


# ----------------------------------------------------------------------------
# Pallas kernel 1: tiled matmul + bias (+ReLU)  -- used for the 1x1 conv
# ----------------------------------------------------------------------------
def _matmul_bias_kernel(a_ref, w_ref, b_ref, o_ref, acc_ref, *, apply_relu):
    @pl.when(pl.program_id(2) == 0)
    def _():
        acc_ref[...] = jnp.zeros_like(acc_ref)

    acc_ref[...] += jnp.dot(a_ref[...], w_ref[...],
                            preferred_element_type=jnp.float32)

    @pl.when(pl.program_id(2) == pl.num_programs(2) - 1)
    def _():
        acc = acc_ref[...] + b_ref[...]          # f32 epilogue, cast at store
        if apply_relu:
            acc = jnp.maximum(acc, 0.0)
        o_ref[...] = acc.astype(o_ref.dtype)


def matmul_bias(a, w, b, apply_relu, out_dtype=jnp.bfloat16):
    """(M,K)@(K,N)+b, optional ReLU.  bf16 MXU inputs, f32 accumulation.

    Lane-sparse N (e.g. Cout=3) is zero-padded to 128 so stores stay unmasked;
    the wrapper slices the valid columns back out.
    """
    M, K = a.shape
    _, N = w.shape
    a = a.astype(jnp.bfloat16)
    w = w.astype(jnp.bfloat16)
    b = b.astype(jnp.float32)

    Np = N if N % 128 == 0 else _round_up(N, 128)
    if Np != N:
        w = jnp.pad(w, ((0, 0), (0, Np - N)))
        b = jnp.pad(b, ((0, Np - N),))

    Mp = _round_up(M, 8)
    if Mp != M:
        a = jnp.pad(a, ((0, Mp - M), (0, 0)))

    tm = _largest_div_tile(Mp, min(512, max(8, Mp // 2)), 8)   # >=2 M blocks
    tn = _largest_div_tile(Np, 512, 128)
    tk = _largest_div_tile(K, 2048, 128)                        # wide K / resident W
    grid = (Mp // tm, Np // tn, K // tk)

    out = pl.pallas_call(
        functools.partial(_matmul_bias_kernel, apply_relu=apply_relu),
        out_shape=jax.ShapeDtypeStruct((Mp, Np), out_dtype),
        grid_spec=pltpu.PrefetchScalarGridSpec(
            num_scalar_prefetch=0,
            grid=grid,
            in_specs=[
                pl.BlockSpec((tm, tk), lambda i, j, k: (i, k)),
                pl.BlockSpec((tk, tn), lambda i, j, k: (k, j)),
                pl.BlockSpec((1, tn), lambda i, j, k: (0, j)),
            ],
            out_specs=pl.BlockSpec((tm, tn), lambda i, j, k: (i, j)),
            scratch_shapes=[pltpu.VMEM((tm, tn), jnp.float32)],
        ),
        compiler_params=pltpu.CompilerParams(
            dimension_semantics=("parallel", "parallel", "arbitrary")),
        cost_estimate=pl.CostEstimate(
            flops=2 * Mp * Np * K,
            transcendentals=0,
            bytes_accessed=(Mp * K * 2 + K * Np * 2
                            + Mp * Np * jnp.dtype(out_dtype).itemsize + Np * 4)),
    )(a, w, b.reshape(1, Np))
    return out[:M, :N]


# ----------------------------------------------------------------------------
# Pallas kernel 2: fused reflection-padded 3x3 conv (im2col fused into K grid)
# ----------------------------------------------------------------------------
def _conv3x3_kernel(x_ref, w_ref, b_ref, o_ref, acc_ref, *, ow, apply_relu):
    ki = pl.program_id(3)

    @pl.when(ki == 0)
    def _():
        acc_ref[...] = jnp.zeros_like(acc_ref)

    x = x_ref[...]                               # (ow+2, Cin) bf16 padded row
    acc = acc_ref[...]
    for kj in range(3):                          # static horizontal taps
        acc = acc + jnp.dot(x[kj:kj + ow, :], w_ref[kj],
                            preferred_element_type=jnp.float32)
    acc_ref[...] = acc

    @pl.when(ki == pl.num_programs(3) - 1)
    def _():
        r = acc_ref[...] + b_ref[...]            # f32 epilogue
        if apply_relu:
            r = jnp.maximum(r, 0.0)
        o_ref[...] = r.astype(o_ref.dtype)


def conv3x3(x, w, b, apply_relu, out_dtype=jnp.bfloat16):
    """ReflectionPad2d(1) + 3x3 VALID conv, NHWC.  No materialized im2col:
    grid = (N, H, Cout_tiles, 3 vertical taps); each step loads one padded row
    and accumulates 3 shifted MXU dots into the f32 VMEM accumulator."""
    N, H, W, Cin = x.shape
    kh, kw, _, Cout = w.shape
    assert (kh, kw) == (3, 3)
    oh, ow = H, W
    xp = jnp.pad(x.astype(jnp.bfloat16), ((0, 0), (1, 1), (1, 1), (0, 0)),
                 mode="reflect")
    wp_ = ow + 2
    w = w.astype(jnp.bfloat16)
    b = b.astype(jnp.float32)

    # Lane-dense output channels for the Cout=3 convs.
    pad_c = (128 - Cout) if (Cout % 128 != 0 and Cout < 16) else 0
    Cp = Cout + pad_c
    if pad_c:
        w = jnp.pad(w, ((0, 0), (0, 0), (0, 0), (0, pad_c)))
        b = jnp.pad(b, ((0, pad_c),))

    tn = Cp if Cp <= 512 else 512                # per-tap weights stay resident
    grid = (N, oh, Cp // tn, 3)

    out = pl.pallas_call(
        functools.partial(_conv3x3_kernel, ow=ow, apply_relu=apply_relu),
        out_shape=jax.ShapeDtypeStruct((N, oh, ow, Cp), out_dtype),
        grid_spec=pltpu.PrefetchScalarGridSpec(
            num_scalar_prefetch=0,
            grid=grid,
            in_specs=[
                # one padded input row, vertical tap offset folded into index_map
                pl.BlockSpec((None, None, wp_, Cin),
                             lambda n, h, j, k: (n, h + k, 0, 0)),
                # per-tap weight slab (3 horizontal taps, Cin, tn)
                pl.BlockSpec((None, 3, Cin, tn),
                             lambda n, h, j, k: (k, 0, 0, j)),
                pl.BlockSpec((1, tn), lambda n, h, j, k: (0, j)),
            ],
            out_specs=pl.BlockSpec((None, None, ow, tn),
                                   lambda n, h, j, k: (n, h, 0, j)),
            scratch_shapes=[pltpu.VMEM((ow, tn), jnp.float32)],
        ),
        compiler_params=pltpu.CompilerParams(
            dimension_semantics=("parallel", "parallel", "parallel", "arbitrary")),
        cost_estimate=pl.CostEstimate(
            flops=2 * N * oh * ow * Cp * 9 * Cin,
            transcendentals=0,
            bytes_accessed=(3 * N * oh * wp_ * Cin * 2 + 9 * Cin * Cp * 2
                            + N * oh * ow * Cp * jnp.dtype(out_dtype).itemsize)),
    )(xp, w, b.reshape(1, Cp))
    if pad_c:
        out = out[..., :Cout]
    return out


def conv2d(x, w, b, apply_relu, out_dtype=jnp.bfloat16):
    if w.shape[0] == 1:                           # 1x1 conv (first encoder layer)
        N, H, W, Cin = x.shape
        Cout = w.shape[-1]
        out = matmul_bias(x.reshape(N * H * W, Cin), w.reshape(Cin, Cout), b,
                          apply_relu, out_dtype)
        return out.reshape(N, H, W, Cout)
    return conv3x3(x, w, b, apply_relu, out_dtype)


# ----------------------------------------------------------------------------
# Pallas kernel 3: per-(N,C) mean / unbiased std over H*W, NHWC layout
# ----------------------------------------------------------------------------
def _mean_std_kernel(x_ref, m_ref, s_ref, sum_ref, sq_ref, *, hw, eps):
    t = pl.program_id(1)

    @pl.when(t == 0)
    def _():
        sum_ref[...] = jnp.zeros_like(sum_ref)
        sq_ref[...] = jnp.zeros_like(sq_ref)

    x = x_ref[...].astype(jnp.float32)                  # (t_hw, C)
    sum_ref[...] += jnp.sum(x, axis=0, keepdims=True)
    sq_ref[...] += jnp.sum(x * x, axis=0, keepdims=True)

    @pl.when(t == pl.num_programs(1) - 1)
    def _():
        mean = sum_ref[...] * (1.0 / hw)
        # torch.var(dim) default is unbiased (n-1); clamp + eps before sqrt.
        var = (sq_ref[...] - hw * mean * mean) / max(hw - 1.0, 1.0)
        var = jnp.maximum(var, 0.0) + eps
        m_ref[...] = mean
        s_ref[...] = jnp.sqrt(var)


def mean_std(feat, eps=1e-5):
    """feat: NHWC -> (mean, std), each (N, 1, C) float32 (C lane-dense)."""
    N, H, W, C = feat.shape
    hw = H * W
    x = feat.reshape(N, hw, C)
    t_hw, hw_pad = _hw_tiling(hw)
    if hw_pad != hw:                                    # zero rows: no effect on sums
        x = jnp.pad(x, ((0, 0), (0, hw_pad - hw), (0, 0)))
    grid = (N, hw_pad // t_hw)
    return pl.pallas_call(
        functools.partial(_mean_std_kernel, hw=float(hw), eps=eps),
        out_shape=(jax.ShapeDtypeStruct((N, 1, C), jnp.float32),
                   jax.ShapeDtypeStruct((N, 1, C), jnp.float32)),
        grid_spec=pltpu.PrefetchScalarGridSpec(
            num_scalar_prefetch=0,
            grid=grid,
            in_specs=[pl.BlockSpec((None, t_hw, C), lambda n, t: (n, t, 0))],
            out_specs=(pl.BlockSpec((None, 1, C), lambda n, t: (n, 0, 0)),
                       pl.BlockSpec((None, 1, C), lambda n, t: (n, 0, 0))),
            scratch_shapes=[pltpu.VMEM((1, C), jnp.float32),
                            pltpu.VMEM((1, C), jnp.float32)],
        ),
        compiler_params=pltpu.CompilerParams(
            dimension_semantics=("parallel", "arbitrary")),
    )(x)


# ----------------------------------------------------------------------------
# Pallas kernel 4: AdaIN apply + alpha blend, folded to  x*scale_eff + shift_eff
# ----------------------------------------------------------------------------
def _affine_kernel(x_ref, scale_ref, shift_ref, o_ref):
    x = x_ref[...].astype(jnp.float32)
    o_ref[...] = (x * scale_ref[...] + shift_ref[...]).astype(o_ref.dtype)


def adain_blend(content, style, alpha, eps=1e-5):
    """alpha*AdaIN(content, style) + (1-alpha)*content, one elementwise pass.

    scale/shift are precomputed once per (N,C) in a tiny XLA op and the alpha
    blend is folded into them:  out = x*(a*ss/cs + 1-a) + a*(sm - cm*ss/cs).
    """
    N, H, W, C = content.shape
    hw = H * W
    cm, cs = mean_std(content, eps)
    sm, ss = mean_std(style, eps)
    scale = ss / cs
    shift = sm - cm * scale
    scale = alpha * scale + (1.0 - alpha)
    shift = alpha * shift

    x = content.reshape(N, hw, C)
    t_hw, hw_pad = _hw_tiling(hw)
    if hw_pad != hw:
        x = jnp.pad(x, ((0, 0), (0, hw_pad - hw), (0, 0)))
    grid = (N, hw_pad // t_hw)
    out = pl.pallas_call(
        _affine_kernel,
        out_shape=jax.ShapeDtypeStruct((N, hw_pad, C), jnp.float32),
        grid_spec=pltpu.PrefetchScalarGridSpec(
            num_scalar_prefetch=0,
            grid=grid,
            in_specs=[pl.BlockSpec((None, t_hw, C), lambda n, t: (n, t, 0)),
                      pl.BlockSpec((None, 1, C), lambda n, t: (n, 0, 0)),
                      pl.BlockSpec((None, 1, C), lambda n, t: (n, 0, 0))],
            out_specs=pl.BlockSpec((None, t_hw, C), lambda n, t: (n, t, 0)),
        ),
        compiler_params=pltpu.CompilerParams(
            dimension_semantics=("parallel", "parallel")),
    )(x, scale, shift)
    return out[:, :hw, :].reshape(N, H, W, C)


# ----------------------------------------------------------------------------
# JAX glue ops (layout plumbing, no heavy compute)
# ----------------------------------------------------------------------------
def maxpool2x2_ceil(x):
    N, H, W, C = x.shape
    ph, pw = (-H) % 2, (-W) % 2
    if ph or pw:
        x = jnp.pad(x, ((0, 0), (0, ph), (0, pw), (0, 0)),
                    constant_values=-jnp.inf)
        N, H, W, C = x.shape
    x = x.reshape(N, H // 2, 2, W // 2, 2, C)
    return x.max(axis=(2, 4))


def upsample_nearest2x(x):
    return jnp.repeat(jnp.repeat(x, 2, axis=1), 2, axis=2)


def mse(a, b):
    a = a.astype(jnp.float32)
    b = b.astype(jnp.float32)
    return jnp.mean((a - b) ** 2)


# ----------------------------------------------------------------------------
# Network definition (mirrors the nn.Sequential graphs; 3x3 conv = pad+conv)
# ----------------------------------------------------------------------------
ENC_STAGES = [
    # stage 1: encoder[:4]
    [("conv", 1, 3, 3, False), ("conv", 3, 3, 64, True)],
    # stage 2: encoder[4:11]
    [("conv", 3, 64, 64, True), ("pool",), ("conv", 3, 64, 128, True)],
    # stage 3: encoder[11:18]
    [("conv", 3, 128, 128, True), ("pool",), ("conv", 3, 128, 256, True)],
    # stage 4: encoder[18:31]
    [("conv", 3, 256, 256, True), ("conv", 3, 256, 256, True),
     ("conv", 3, 256, 256, True), ("pool",), ("conv", 3, 256, 512, True)],
]

DEC_OPS = [
    ("conv", 3, 512, 256, True), ("up",),
    ("conv", 3, 256, 256, True), ("conv", 3, 256, 256, True),
    ("conv", 3, 256, 256, True), ("conv", 3, 256, 128, True), ("up",),
    ("conv", 3, 128, 128, True), ("conv", 3, 128, 64, True), ("up",),
    ("conv", 3, 64, 64, True), ("conv", 3, 64, 3, False),
]


def init_conv_params(key, ops, *, decoder_init):
    """encoder: He-normal W, zero bias (frozen VGG stand-in);
    decoder: all params ~ N(0, 0.01), matching init_decoder_weights(0.0, 0.01)."""
    params = []
    for op in ops:
        if op[0] != "conv":
            continue
        _, k, cin, cout, _ = op
        key, kw_, kb_ = jax.random.split(key, 3)
        if decoder_init:
            w = 0.01 * jax.random.normal(kw_, (k, k, cin, cout), jnp.float32)
            b = 0.01 * jax.random.normal(kb_, (cout,), jnp.float32)
        else:
            std = (2.0 / (k * k * cin)) ** 0.5
            w = std * jax.random.normal(kw_, (k, k, cin, cout), jnp.float32)
            b = jnp.zeros((cout,), jnp.float32)
        params.append((w, b))
    return params, key


def run_ops(x, ops, params, final_conv_f32=False):
    # Intermediate activations are emitted in bf16 (next conv consumes bf16
    # anyway; stats kernels accumulate in f32).  Only the final decoder conv
    # (the generated image) is emitted in f32.
    p = 0
    n_convs = sum(1 for op in ops if op[0] == "conv")
    for op in ops:
        if op[0] == "pool":
            x = maxpool2x2_ceil(x)
        elif op[0] == "up":
            x = upsample_nearest2x(x)
        elif op[0] == "conv":
            w, b = params[p]
            p += 1
            dt = jnp.float32 if (final_conv_f32 and p == n_convs) else jnp.bfloat16
            x = conv2d(x, w, b, op[4], dt)
        else:
            raise ValueError(op)
    return x


def encode(x, enc_params):
    feats = []
    p = 0
    for stage in ENC_STAGES:
        n_conv = sum(1 for op in stage if op[0] == "conv")
        x = run_ops(x, stage, enc_params[p:p + n_conv])
        p += n_conv
        feats.append(x)
    return tuple(feats)  # (relu1_1, relu2_1, relu3_1, relu4_1)


def style_loss(inp, tgt, eps=1e-5):
    im, istd = mean_std(inp, eps)
    tm, tstd = mean_std(tgt, eps)
    return mse(im, tm) + mse(istd, tstd)


def adain_forward(content, style, enc_params, dec_params, alpha=1.0,
                  training=True):
    """content/style: NHWC float32.  Matches AdaIN_net.forward."""
    content_feat = encode(content, enc_params)[-1]
    style_feats = encode(style, enc_params)
    t = adain_blend(content_feat, style_feats[-1], alpha)   # blend folded in
    generated = run_ops(t, DEC_OPS, dec_params, final_conv_f32=True)
    if training:
        g_feats = encode(generated, enc_params)
        loss_c = mse(g_feats[-1], t)
        loss_s = style_loss(g_feats[0], style_feats[0])
        for i in range(1, 4):
            loss_s = loss_s + style_loss(g_feats[i], style_feats[i])
        return loss_c, loss_s
    return generated
    # TODO(synk): a size-threshold XLA fallback for the tiny toy-shape convs
    # (launch overhead dominated) was considered but left out so all conv
    # compute stays on the Pallas path.


# ----------------------------------------------------------------------------
if __name__ == "__main__":
    key = jax.random.PRNGKey(0)

    all_enc_ops = [op for stage in ENC_STAGES for op in stage]
    enc_params, key = init_conv_params(key, all_enc_ops, decoder_init=False)
    dec_params, key = init_conv_params(key, DEC_OPS, decoder_init=True)

    # Inputs in the module's native NCHW layout, then moved to NHWC once.
    key, kc, ks = jax.random.split(key, 3)
    content_nchw = jax.random.normal(kc, (2, 3, 16, 16), jnp.float32)
    style_nchw = jax.random.normal(ks, (2, 3, 16, 16), jnp.float32)
    content = content_nchw.transpose(0, 2, 3, 1)  # NHWC
    style = style_nchw.transpose(0, 2, 3, 1)      # NHWC

    # Training path (module default: training=True -> returns losses).
    loss_c, loss_s = adain_forward(content, style, enc_params, dec_params,
                                   alpha=1.0, training=True)
    jax.block_until_ready((loss_c, loss_s))

    # Eval path (training=False -> generated image, NHWC).
    img = adain_forward(content, style, enc_params, dec_params,
                        alpha=1.0, training=False)
    jax.block_until_ready(img)

    assert img.shape == (2, 16, 16, 3)
    assert jnp.isfinite(loss_c) and jnp.isfinite(loss_s)
    assert bool(jnp.all(jnp.isfinite(img)))
    print("KERNEL_OK")
</pallas_src>

<mosaic_0001>
module attributes {stable_mosaic.version = 11 : i64} {
  func.func @_matmul_bias_kernel(%arg0: i32, %arg1: i32, %arg2: i32, %arg3: memref<256x3xbf16, #tpu.memory_space<vmem>>, %arg4: memref<3x128xbf16, #tpu.memory_space<vmem>>, %arg5: memref<1x128xf32, #tpu.memory_space<vmem>>, %arg6: memref<256x128xbf16, #tpu.memory_space<vmem>>, %arg7: memref<256x128xf32, #tpu.memory_space<vmem>>) attributes {dimension_semantics = [#tpu.dimension_semantics<parallel>, #tpu.dimension_semantics<parallel>, #tpu.dimension_semantics<arbitrary>], iteration_bounds = array<i64: 2, 1, 1>, scalar_prefetch = 0 : i64, scratch_operands = 1 : i64, tpu.core_type = #tpu.core_type<tc>, window_params = [{transform_indices = @transform_0, window_bounds = array<i64: 256, 3>}, {transform_indices = @transform_1, window_bounds = array<i64: 3, 128>}, {transform_indices = @transform_2, window_bounds = array<i64: 1, 128>}, {transform_indices = @transform_3, window_bounds = array<i64: 256, 128>}]} {
    %c0_i32 = arith.constant 0 : i32
    %0 = arith.cmpi eq, %arg2, %c0_i32 : i32
    %1 = arith.extui %0 : i1 to i32
    %c0_i32_0 = arith.constant 0 : i32
    %2 = arith.cmpi ne, %1, %c0_i32_0 : i32
    scf.if %2 {
      %cst_10 = arith.constant 0.000000e+00 : f32
      %12 = vector.broadcast %cst_10 : f32 to vector<256x128xf32>
      %c0_11 = arith.constant 0 : index
      %c0_12 = arith.constant 0 : index
      %13 = vector.load %arg7[%c0_11, %c0_12] : memref<256x128xf32, #tpu.memory_space<vmem>>, vector<256x128xf32>
      tpu.vector_store %arg7[%c0_11, %c0_12], %12 {strides = array<i32>} : memref<256x128xf32, #tpu.memory_space<vmem>>, vector<256x128xf32>,
    } else {
    }
    %c0 = arith.constant 0 : index
    %c0_1 = arith.constant 0 : index
    %3 = vector.load %arg7[%c0, %c0_1] : memref<256x128xf32, #tpu.memory_space<vmem>>, vector<256x128xf32>
    %c0_2 = arith.constant 0 : index
    %c0_3 = arith.constant 0 : index
    %4 = vector.load %arg3[%c0_2, %c0_3] : memref<256x3xbf16, #tpu.memory_space<vmem>>, vector<256x3xbf16>
    %c0_4 = arith.constant 0 : index
    %c0_5 = arith.constant 0 : index
    %5 = vector.load %arg4[%c0_4, %c0_5] : memref<3x128xbf16, #tpu.memory_space<vmem>>, vector<3x128xbf16>
    %cst = arith.constant dense<0.000000e+00> : vector<256x128xf32>
    %6 = tpu.matmul %4, %5, %cst {dimension_numbers = #tpu.dot_dimension_numbers<[1], [0], [0], [1], [0, 0, 1, 1], [], []>} : vector<256x3xbf16>, vector<3x128xbf16>, vector<256x128xf32> -> vector<256x128xf32>
    %7 = arith.addf %3, %6 : vector<256x128xf32>
    %c0_6 = arith.constant 0 : index
    %c0_7 = arith.constant 0 : index
    %8 = vector.load %arg7[%c0_6, %c0_7] : memref<256x128xf32, #tpu.memory_space<vmem>>, vector<256x128xf32>
    tpu.vector_store %arg7[%c0_6, %c0_7], %7 {strides = array<i32>} : memref<256x128xf32, #tpu.memory_space<vmem>>, vector<256x128xf32>,
    %c0_i32_8 = arith.constant 0 : i32
    %9 = arith.cmpi eq, %arg2, %c0_i32_8 : i32
    %10 = arith.extui %9 : i1 to i32
    %c0_i32_9 = arith.constant 0 : i32
    %11 = arith.cmpi ne, %10, %c0_i32_9 : i32
    scf.if %11 {
      %c0_10 = arith.constant 0 : index
      %c0_11 = arith.constant 0 : index
      %12 = vector.load %arg7[%c0_10, %c0_11] : memref<256x128xf32, #tpu.memory_space<vmem>>, vector<256x128xf32>
      %c0_12 = arith.constant 0 : index
      %c0_13 = arith.constant 0 : index
      %13 = vector.load %arg5[%c0_12, %c0_13] : memref<1x128xf32, #tpu.memory_space<vmem>>, vector<1x128xf32>
      %14 = vector.broadcast %13 : vector<1x128xf32> to vector<256x128xf32>
      %15 = arith.addf %12, %14 : vector<256x128xf32>
      %16 = arith.truncf %15 : vector<256x128xf32> to vector<256x128xbf16>
      %c0_14 = arith.constant 0 : index
      %c0_15 = arith.constant 0 : index
      %17 = vector.load %arg6[%c0_14, %c0_15] : memref<256x128xbf16, #tpu.memory_space<vmem>>, vector<256x128xbf16>
      tpu.vector_store %arg6[%c0_14, %c0_15], %16 {strides = array<i32>} : memref<256x128xbf16, #tpu.memory_space<vmem>>, vector<256x128xbf16>,
    } else {
    }
    return
  }
  func.func @transform_0(%arg0: i32, %arg1: i32, %arg2: i32) -> (i32, i32) {
    %c0_i32 = arith.constant 0 : i32
    return %arg0, %arg2 : i32, i32
  }
  func.func @transform_1(%arg0: i32, %arg1: i32, %arg2: i32) -> (i32, i32) {
    %c0_i32 = arith.constant 0 : i32
    return %arg2, %arg1 : i32, i32
  }
  func.func @transform_2(%arg0: i32, %arg1: i32, %arg2: i32) -> (i32, i32) {
    %c0_i32 = arith.constant 0 : i32
    %c0_i32_0 = arith.constant 0 : i32
    return %c0_i32, %arg1 : i32, i32
  }
  func.func @transform_3(%arg0: i32, %arg1: i32, %arg2: i32) -> (i32, i32) {
    %c0_i32 = arith.constant 0 : i32
    return %arg0, %arg1 : i32, i32
  }
}

</mosaic_0001>

<bundles_post_ra>
// kernel: tpu_custom_call.1
= control target key start
LH: loop header
LB: loop body
LE: loop exit
PB: predicated region body
PF: predicated region fallthrough
CT: control target
= control target key end

     0   :  { %8 = vsyncpa [#allocation4], 0  ;;  %s1444_s0 = inlined_call_operand.vmem [shape: bf16[512,3], index: 0, kind: input, shape index: {}]   ;;  %s1445_s1 = inlined_call_operand.vmem [shape: bf16[3,128], index: 1, kind: input, shape index: {}]   ;;  %s1446_s2 = inlined_call_operand.vmem [shape: f32[1,128], index: 2, kind: input, shape index: {}]   ;;  %s1447_s3 = inlined_call_operand.hbm [shape: bf16[512,128], index: 3, kind: output, shape index: {}]  }
   0x1   :  { %10 = vsyncpa [#allocation4 + $0x1], 0  ;;  %s1269_s12 = smov 0   ;;  %s1271_s13 = smov 0  }
   0x2   :  { %s1273_s14 = smov 0   ;;  %s1275_s15 = smov 0  }
   0x3   :  { %s1277_s16 = smov 0   ;;  %s1279_s17 = smov 0  }
   0x4 LB: > { %s897_s18 = sadd.s32 4294967295, %s1244_s17   ;;  %s898_s19 = sadd.s32 4294967294, %s1244_s17   ;;  %s1244_s17 = sphi %s1279_s17, %s16_s17   ;;  %s1240_s16 = sphi %s1277_s16, %s1454_s16   ;;  %s1236_s15 = sphi %s1275_s15, %s1453_s15   ;;  %s1232_s14 = sphi %s1273_s14, %s1452_s14   ;;  %s1228_s13 = sphi %s1271_s13, %s1451_s13   ;;  %s1224_s12 = sphi %s1269_s12, %s1450_s12  }
   0x5   : > { %s35_s20 = sadd.s32 1, %s1240_s16  ;;  %s126_s21 = sadd.s32 1, %s1232_s14 }
   0x6   : > { %p37_p0 = scmp.ge.s32.totalorder %s35_s20, 2  ;;  %p136_p1 = scmp.ne.s32.totalorder %s1232_s14, %s1228_s13 }
   0x7   : > { %p137_p2 = scmp.eq.s32.totalorder %s897_s18, 1  ;;  %p142_p3 = scmp.ne.s32.totalorder %s1228_s13, %s1224_s12 }
   0x8   : > { %s1456_s20 = smov (%p37_p0, %s35_s20), 0  ;;  %p143_p5 = scmp.eq.s32.totalorder %s898_s19, 1 }
   0x9   : > { %p1309_p4 = por %p137_p2, %p136_p1  ;;  %s121_s23 = ssub.s32 %s1240_s16, %s1456_s20 }
   0xa   : > { %p903_p6 = scmp.ge.s32.totalorder %s1244_s17, 1  ;;  %p124_p7 = scmp.eq.s32.totalorder %s121_s23, 0 }
   0xb   : > { %p1316_p8 = por %p143_p5, %p142_p3  ;;  %p189_p9 = scmp.lt.s32.totalorder %s1244_s17, 3 }
   0xc   : > { %s1322_s25 = scalar_select %p124_p7, %s1232_s14, %s126_s21  }
   0xd   : > { %p190_p10 = pnand %p903_p6, %p189_p9 }
   0xe   : > { %s905_s28 = sshll.u32 (!%p190_p10), %s1236_s15, 5  ;;  %s223_s6 = sand.u32 (!%p190_p10), 1, %s1228_s13  }
   0xf   : > { %193 = sbr.rel (%p190_p10) target bundleno = 226 (0xe2), region = 32  ;;  %p227_p11 = scmp.lt.s32.totalorder (!%p190_p10), %s905_s28, 63 }
  0x10   : > { %s904_s9 = sshll.u32 (!%p190_p10), %s223_s6, 7  ;;  %s1008_s11 = sshll.u32 (!%p190_p10), %s1236_s15, 7 }
  0x11   : > { %s1359_s10 = scalar_lea.vmem (!%p190_p10), [#allocation3], %s904_s9  ;;  %s785_s21 = scalar_lea.hbm (!%p190_p10), %s1447_s3, %s1008_s11 }
  0x12   : > { %s786_s23 = sshll.u32 (!%p190_p10), %s1359_s10, 4  ;;  %s788_s26 = sshll.u32 (!%p190_p10), %s785_s21, 4  ;;  %s787_s23 = int_to_ptr.vmem [resolvable:$true] %s786_s23  ;;  %s789_s26 = int_to_ptr.hbm [resolvable:$true] %s788_s26 }
  0x13   : > { %s773_s15 = scalar_lea.sflag (!%p190_p10), [#allocation4], %s223_s6  ;;  %s1180_s27 = sshra.s32 (!%p190_p10), %s789_s26, 4  ;;  %s1181_s27 = int_to_ptr.hbm [resolvable:$true] %s1180_s27 }
  0x14   : > { %v347_v0 = vld [vmem:[%s1445_s1] sm:$0x3]  ;;  %vm477_vm0 = vcmask 1040384   ;;  %vm478_vm1 = vcmask 1041408   ;;  %v1246_v1 = vmov 65535   ;;  %s1458_s28 = smov (!%p227_p11, %s905_s28), 63  ;;  %p1187_p1 = scmp.lt.s32.totalorder %s1181_s27, %s1447_s3 }
  0x15   : > { %v479_v2 = vsel %vm477_vm0, 4294967295, %v1246_v1  ;;  %s906_s29 = sshll.u32 %s1458_s28, 2  ;;  %vm428_vm2 = vcmask 23552   ;;  %v1351_v23 = vld [vmem:[%s1446_s2] ss:$0 sm:$0xff]  ;;  %s1182_s28 = scalar_lea.hbm %s1181_s27, 128 }
  0x16   : > { %v480_v3 = vsel %vm478_vm1, %v479_v2, 0  ;;  %s233_s5 = scalar_lea.vmem %s1444_s0, %s906_s29  ;;  %p1183_p12 = scmp.ne.s32.totalorder %s1181_s27, %s1182_s28 }
  0x17   : > { %v482_v4 = vand.u32 %v480_v3, %v347_v0  ;;  %v992_v5 = vld [vmem:[%s233_s5] sm:$0xff]  ;;  %v993_v9 = vld [vmem:[%s233_s5 + $0x8] sm:$0xff]  ;;  %v994_v13 = vld [vmem:[%s233_s5 + $0x10] sm:$0xff]  ;;  %s1186_s4 = scalar_lea.hbm %s1447_s3, 256 }
  0x18   : > { %v996_v6 = vld [vmem:[%s233_s5 + $0x20] sm:$0xff]  ;;  %v997_v10 = vld [vmem:[%s233_s5 + $0x28] sm:$0xff]  ;;  %v998_v14 = vld [vmem:[%s233_s5 + $0x30] sm:$0xff]  ;;  %p1184_p13 = pnand %p1183_p12, %p1309_p4  ;;  %p1188_p2 = scmp.lt.s32.totalorder %s1186_s4, %s1182_s28 }
  0x19   : > { %491 = vmatpush.bf16.msra.mxu0 %v482_v4  ;;  %1104 = vmatpush.bf16.msra.mxu1 %v482_v4  ;;  %v1000_v7 = vld [vmem:[%s233_s5 + $0x40] sm:$0xff]  ;;  %v1001_v11 = vld [vmem:[%s233_s5 + $0x48] sm:$0xff]  ;;  %v1002_v15 = vld [vmem:[%s233_s5 + $0x50] sm:$0xff] }
  0x1a   : > { %1105 = vmatpush.bf16.msra.mxu2 %v482_v4  ;;  %1106 = vmatpush.bf16.msra.mxu3 %v482_v4  ;;  %v1004_v8 = vld [vmem:[%s233_s5 + $0x60] sm:$0xff]  ;;  %v1005_v12 = vld [vmem:[%s233_s5 + $0x68] sm:$0xff]  ;;  %v1006_v16 = vld [vmem:[%s233_s5 + $0x70] sm:$0xff]  ;;  %p1185_p0 = pneg %p1184_p13  ;;  %p1189_p3 = por %p1188_p2, %p1187_p1 }
  0x1b   : > { %v995_v17 = vld [vmem:[%s233_s5 + $0x18] sm:$0xff] }
  0x1c   : > { %971 = vmatmul.msk.bf16.vlgmr.msra.gmra.mxu0 %vm428_vm2, %v992_v5  ;;  %975 = vmatmul.msk.bf16.vlgmr.msra.gmra.mxu1 %vm428_vm2, %v996_v6  ;;  %v999_v18 = vld [vmem:[%s233_s5 + $0x38] sm:$0xff]  ;;  %p1190_p5 = pnand %p1189_p3, %p1185_p0 }
  0x1d   : > { %979 = vmatmul.msk.bf16.vlgmr.msra.gmra.mxu2 %vm428_vm2, %v1000_v7  ;;  %983 = vmatmul.msk.bf16.vlgmr.msra.gmra.mxu3 %vm428_vm2, %v1004_v8  ;;  %v1003_v19 = vld [vmem:[%s233_s5 + $0x58] sm:$0xff] }
  0x1e   : > { %v1007_v20 = vld [vmem:[%s233_s5 + $0x78] sm:$0xff] }
  0x2c   : > { %972 = vmatmul.msk.bf16.gmra.mxu0 %vm428_vm2, %v993_v9  ;;  %976 = vmatmul.msk.bf16.gmra.mxu1 %vm428_vm2, %v997_v10 }
  0x2d   : > { %980 = vmatmul.msk.bf16.gmra.mxu2 %vm428_vm2, %v1001_v11  ;;  %984 = vmatmul.msk.bf16.gmra.mxu3 %vm428_vm2, %v1005_v12 }
  0x3c   : > { %973 = vmatmul.msk.bf16.gmra.mxu0 %vm428_vm2, %v994_v13  ;;  %977 = vmatmul.msk.bf16.gmra.mxu1 %vm428_vm2, %v998_v14 }
  0x3d   : > { %981 = vmatmul.msk.bf16.gmra.mxu2 %vm428_vm2, %v1002_v15  ;;  %985 = vmatmul.msk.bf16.gmra.mxu3 %vm428_vm2, %v1006_v16 }
  0x4c   : > { %974 = vmatmul.msk.bf16.gmra.mxu0 %vm428_vm2, %v995_v17  ;;  %978 = vmatmul.msk.bf16.gmra.mxu1 %vm428_vm2, %v999_v18 }
  0x4d   : > { %982 = vmatmul.msk.bf16.gmra.mxu2 %vm428_vm2, %v1003_v19  ;;  %986 = vmatmul.msk.bf16.gmra.mxu3 %vm428_vm2, %v1007_v20 }
  0x99   : > { %v493_v21 = vpop.f32.mrf.mxu0  ;;  %v513_v22 = vpop.f32.mrf.mxu1 }
  0x9a   : > { %v676_v28 = vadd.f32 %v1351_v23, %v493_v21  ;;  %v684_v29 = vadd.f32 %v1351_v23, %v513_v22 }
  0xa0   : > { %v533_v24 = vpop.f32.mrf.mxu2  ;;  %v553_v25 = vpop.f32.mrf.mxu3 }
  0xa1   : > { %v495_v26 = vpop.f32.mrf.mxu0  ;;  %v515_v27 = vpop.f32.mrf.mxu1  ;;  %v692_v36 = vadd.f32 %v1351_v23, %v533_v24  ;;  %v700_v37 = vadd.f32 %v1351_v23, %v553_v25 }
  0xa2   : > { %v677_v30 = vadd.f32 %v1351_v23, %v495_v26  ;;  %v685_v31 = vadd.f32 %v1351_v23, %v515_v27 }
  0xa4   : > { %v1012_v32 = vpack.c.bf16 %v677_v30, %v676_v28  ;;  %v1032_v33 = vpack.c.bf16 %v685_v31, %v684_v29 }
  0xa6   : > { %1013 = vst [vmem:[%s1359_s10] sm:$0xff] %v1012_v32  }
  0xa7   : > { %1092 = vst [vmem:[%s1359_s10 + $0x20] sm:$0xff] %v1032_v33  }
  0xa8   : > { %v535_v34 = vpop.f32.mrf.mxu2  ;;  %v555_v35 = vpop.f32.mrf.mxu3 }
  0xa9   : > { %v693_v38 = vadd.f32 %v1351_v23, %v535_v34  ;;  %v701_v39 = vadd.f32 %v1351_v23, %v555_v35  ;;  %v498_v40 = vpop.f32.mrf.mxu0  ;;  %v518_v41 = vpop.f32.mrf.mxu1 }
  0xaa   : > { %v678_v48 = vadd.f32 %v1351_v23, %v498_v40  ;;  %v686_v49 = vadd.f32 %v1351_v23, %v518_v41 }
  0xab   : > { %v1052_v42 = vpack.c.bf16 %v693_v38, %v692_v36  ;;  %v1072_v43 = vpack.c.bf16 %v701_v39, %v700_v37 }
  0xad   : > { %1096 = vst [vmem:[%s1359_s10 + $0x40] sm:$0xff] %v1052_v42  }
  0xae   : > { %1100 = vst [vmem:[%s1359_s10 + $0x60] sm:$0xff] %v1072_v43  }
  0xb0   : > { %v538_v44 = vpop.f32.mrf.mxu2  ;;  %v558_v45 = vpop.f32.mrf.mxu3 }
  0xb1   : > { %v500_v46 = vpop.f32.mrf.mxu0  ;;  %v520_v47 = vpop.f32.mrf.mxu1  ;;  %v694_v56 = vadd.f32 %v1351_v23, %v538_v44  ;;  %v702_v57 = vadd.f32 %v1351_v23, %v558_v45 }
  0xb2   : > { %v679_v50 = vadd.f32 %v1351_v23, %v500_v46  ;;  %v687_v51 = vadd.f32 %v1351_v23, %v520_v47 }
  0xb4   : > { %v1017_v52 = vpack.c.bf16 %v679_v50, %v678_v48  ;;  %v1037_v53 = vpack.c.bf16 %v687_v51, %v686_v49 }
  0xb6   : > { %1089 = vst [vmem:[%s1359_s10 + $0x8] sm:$0xff] %v1017_v52  }
  0xb7   : > { %1093 = vst [vmem:[%s1359_s10 + $0x28] sm:$0xff] %v1037_v53  }
  0xb8   : > { %v540_v54 = vpop.f32.mrf.mxu2  ;;  %v560_v55 = vpop.f32.mrf.mxu3 }
  0xb9   : > { %v695_v58 = vadd.f32 %v1351_v23, %v540_v54  ;;  %v703_v59 = vadd.f32 %v1351_v23, %v560_v55  ;;  %v503_v60 = vpop.f32.mrf.mxu0  ;;  %v523_v61 = vpop.f32.mrf.mxu1 }
  0xba   : > { %v680_v4 = vadd.f32 %v1351_v23, %v503_v60  ;;  %v688_v5 = vadd.f32 %v1351_v23, %v523_v61 }
  0xbb   : > { %v1057_v62 = vpack.c.bf16 %v695_v58, %v694_v56  ;;  %v1077_v63 = vpack.c.bf16 %v703_v59, %v702_v57 }
  0xbd   : > { %1097 = vst [vmem:[%s1359_s10 + $0x48] sm:$0xff] %v1057_v62  }
  0xbe   : > { %1101 = vst [vmem:[%s1359_s10 + $0x68] sm:$0xff] %v1077_v63  }
  0xc0   : > { %v543_v0 = vpop.f32.mrf.mxu2  ;;  %v563_v1 = vpop.f32.mrf.mxu3 }
  0xc1   : > { %v505_v2 = vpop.f32.mrf.mxu0  ;;  %v525_v3 = vpop.f32.mrf.mxu1  ;;  %v696_v12 = vadd.f32 %v1351_v23, %v543_v0  ;;  %v704_v13 = vadd.f32 %v1351_v23, %v563_v1 }
  0xc2   : > { %v681_v6 = vadd.f32 %v1351_v23, %v505_v2  ;;  %v689_v7 = vadd.f32 %v1351_v23, %v525_v3 }
  0xc4   : > { %v1022_v8 = vpack.c.bf16 %v681_v6, %v680_v4  ;;  %v1042_v9 = vpack.c.bf16 %v689_v7, %v688_v5 }
  0xc6   : > { %1090 = vst [vmem:[%s1359_s10 + $0x10] sm:$0xff] %v1022_v8  }
  0xc7   : > { %1094 = vst [vmem:[%s1359_s10 + $0x30] sm:$0xff] %v1042_v9  }
  0xc8   : > { %v545_v10 = vpop.f32.mrf.mxu2  ;;  %v565_v11 = vpop.f32.mrf.mxu3 }
  0xc9   : > { %v697_v14 = vadd.f32 %v1351_v23, %v545_v10  ;;  %v705_v15 = vadd.f32 %v1351_v23, %v565_v11  ;;  %v508_v16 = vpop.f32.mrf.mxu0  ;;  %v528_v17 = vpop.f32.mrf.mxu1 }
  0xca   : > { %v682_v25 = vadd.f32 %v1351_v23, %v508_v16  ;;  %v690_v26 = vadd.f32 %v1351_v23, %v528_v17 }
  0xcb   : > { %v1062_v18 = vpack.c.bf16 %v697_v14, %v696_v12  ;;  %v1082_v19 = vpack.c.bf16 %v705_v15, %v704_v13 }
  0xcd   : > { %1098 = vst [vmem:[%s1359_s10 + $0x50] sm:$0xff] %v1062_v18  }
  0xce   : > { %1102 = vst [vmem:[%s1359_s10 + $0x70] sm:$0xff] %v1082_v19  }
  0xd0   : > { %v548_v20 = vpop.f32.mrf.mxu2  ;;  %v568_v21 = vpop.f32.mrf.mxu3 }
  0xd1   : > { %v510_v22 = vpop.f32.mrf.mxu0  ;;  %v530_v24 = vpop.f32.mrf.mxu1  ;;  %v698_v33 = vadd.f32 %v1351_v23, %v548_v20  ;;  %v706_v34 = vadd.f32 %v1351_v23, %v568_v21 }
  0xd2   : > { %v683_v27 = vadd.f32 %v1351_v23, %v510_v22  ;;  %v691_v28 = vadd.f32 %v1351_v23, %v530_v24 }
  0xd4   : > { %v1027_v29 = vpack.c.bf16 %v683_v27, %v682_v25  ;;  %v1047_v30 = vpack.c.bf16 %v691_v28, %v690_v26 }
  0xd6   : > { %1091 = vst [vmem:[%s1359_s10 + $0x18] sm:$0xff] %v1027_v29  }
  0xd7   : > { %1095 = vst [vmem:[%s1359_s10 + $0x38] sm:$0xff] %v1047_v30  }
  0xd8   : > { %v550_v31 = vpop.f32.mrf.mxu2  ;;  %v570_v32 = vpop.f32.mrf.mxu3 }
  0xd9   : > { %v699_v35 = vadd.f32 %v1351_v23, %v550_v31  ;;  %v707_v36 = vadd.f32 %v1351_v23, %v570_v32 }
  0xdb   : > { %v1067_v37 = vpack.c.bf16 %v699_v35, %v698_v33  ;;  %v1087_v38 = vpack.c.bf16 %v707_v36, %v706_v34 }
  0xdd   : > { %1099 = vst [vmem:[%s1359_s10 + $0x58] sm:$0xff] %v1067_v37  }
  0xde   : > { %1103 = vst [vmem:[%s1359_s10 + $0x78] sm:$0xff] %v1087_v38  }
  0xdf   : > { %1193 = shalt.err (!%p1190_p5)
}
  0xe0   : > { %s1247_s6 = smov 64   ;;  %s1248_s8 = smov 4  }
  0xe1   : > { %1107 = dma.vmem_to_hbm [thread:$0]  (%p1309_p4), %s787_s23, 2048, %s789_s26, %s773_s15, %s1247_s6, %s1247_s6, %s1248_s8  }
  0xe2 PF: > { %p1113_p6 = scmp.ge.s32.totalorder %s1244_s17, 2  ;;  %s803_s9 = sand.u32 1, %s1224_s12  }
  0xe3   : > { %s804_s10 = scalar_lea.sflag [#allocation4], %s803_s9 }
  0xe4   : > { %p1110_p7 = pnand %p1113_p6, %p1316_p8 }
  0xe6   : > { %p1111_p9 = pneg %p1110_p7 }
  0xe8   : > { %1219 = dma.done.wait (%p1111_p9), %s804_s10, 2048  }
  0xe9   : > { %1221 = vsyncadd (%p1111_p9), %s804_s10, 4294965248  ;;  %s16_s17 = sadd.s32 1, %s1244_s17   ;;  %s1450_s12 = smov %s1228_s13 }
  0xea   : > { %p13_p10 = scmp.ge.s32.totalorder %s16_s17, 4   ;;  %s1451_s13 = smov %s1232_s14 }
  0xeb   : > { %s1452_s14 = smov %s1322_s25  ;;  %s1453_s15 = smov %s1240_s16 }
  0xec   : > { %s1454_s16 = smov %s1456_s20  ;;  %15 = sbr.rel (!%p13_p10) target bundleno = 4 (0x4), region = 81 }
  0xf1   :  { %810 = vsyncpa [#allocation4], 1 }
  0xf2   :  { %812 = vsyncpa [#allocation4 + $0x1], 1 }

</bundles_post_ra>
